<compile_context>
chip_gen: v7x
topology: tpu7x:2x2x1
jax: 0.10.0
libtpu: 0.0.40
codegen_flags: <defaults>
</compile_context>

<pallas_src>
import math

import jax
import jax.numpy as jnp
from jax.experimental import pallas as pl
from jax.experimental.pallas import tpu as pltpu


def _pos_enc_kernel(steps_ref, pe_ref, x_ref, o_ref):
    # steps_ref: SMEM (1,) f32; pe_ref: (1, W) VMEM; x_ref/o_ref: (T, W) VMEM.
    bias = 1.0 - steps_ref[0] * (1.0 / 500.0)              # scalar-ALU path
    enc = (pe_ref[...] + bias).astype(x_ref.dtype)         # (1, W), single VPU add
    o_ref[...] = (x_ref[...] + enc).astype(o_ref.dtype)    # broadcast over rows


def _round_up(n, m):
    return ((n + m - 1) // m) * m


def positional_encoding_forward(observation_embedding, steps, position_encoding,
                                tile_rows=4096):
    """observation_embedding: (B, D), steps: scalar, position_encoding: (D,)
    (the module's zeros(50) parameter).  Returns (B, D) in the input dtype."""
    x = observation_embedding
    B, D = x.shape
    out_dtype = x.dtype

    steps_arr = jnp.asarray(steps, dtype=jnp.float32).reshape((1,))
    pe_f32 = position_encoding.astype(jnp.float32).reshape((D,))

    # How many batch rows must be folded together for a lane-dense (128-multiple) row.
    group = 128 // math.gcd(D, 128)
    W = group * D

    # Lane-dense path only pays off when B is large enough that the group
    # padding is amortized; otherwise fall back to the simple (B, D) layout.
    use_lane_dense = (group > 1) and (B >= 4 * group)

    if use_lane_dense:
        tile_g = max(8, _round_up(max(1, tile_rows // group), 8))
        G = pl.cdiv(B, group)
        tile_g = min(tile_g, _round_up(G, 8))
        G_pad = _round_up(G, tile_g)
        B_pad = G_pad * group
        if B_pad != B:
            x = jnp.pad(x, ((0, B_pad - B), (0, 0)))
        x = x.reshape(G_pad, W)                          # free row-major reshape
        pe_tile = jnp.tile(pe_f32, group).reshape(1, W)  # tiny (1, W) constant

        out = pl.pallas_call(
            _pos_enc_kernel,
            out_shape=jax.ShapeDtypeStruct((G_pad, W), out_dtype),
            grid=(G_pad // tile_g,),
            in_specs=[
                pl.BlockSpec(memory_space=pltpu.MemorySpace.SMEM),   # steps scalar
                pl.BlockSpec((1, W), lambda i: (0, 0)),               # tiled pe
                pl.BlockSpec((tile_g, W), lambda i: (i, 0)),          # x (lane-dense)
            ],
            out_specs=pl.BlockSpec((tile_g, W), lambda i: (i, 0)),
            compiler_params=pltpu.CompilerParams(
                dimension_semantics=("parallel",),                    # dual-TC on v7x
            ),
        )(steps_arr, pe_tile, x)
        out = out.reshape(B_pad, D)
        return out[:B] if B_pad != B else out

    # ---- small-B / fallback path: plain (B, D) tiling ----
    tile_b = max(8, min(_round_up(tile_rows, 8), _round_up(B, 8)))
    B_pad = _round_up(B, tile_b)
    if B_pad != B:
        x = jnp.pad(x, ((0, B_pad - B), (0, 0)))
    pe_2d = pe_f32.reshape(1, D)

    out = pl.pallas_call(
        _pos_enc_kernel,
        out_shape=jax.ShapeDtypeStruct((B_pad, D), out_dtype),
        grid=(B_pad // tile_b,),
        in_specs=[
            pl.BlockSpec(memory_space=pltpu.MemorySpace.SMEM),        # steps scalar
            pl.BlockSpec((1, D), lambda i: (0, 0)),                    # position_encoding
            pl.BlockSpec((tile_b, D), lambda i: (i, 0)),               # observation_embedding
        ],
        out_specs=pl.BlockSpec((tile_b, D), lambda i: (i, 0)),
        compiler_params=pltpu.CompilerParams(
            dimension_semantics=("parallel",),
        ),
    )(steps_arr, pe_2d, x)
    return out[:B] if B_pad != B else out


if __name__ == "__main__":
    key = jax.random.PRNGKey(0)

    B, D = 8, 50                       # D=50 fixed by the module's zeros(50)
    x = jax.random.normal(key, (B, D), dtype=jnp.float32)
    steps = jnp.float32(7.0)

    # Module-faithful parameter init: zeros(50).
    position_encoding = jnp.zeros((D,), dtype=jnp.float32)

    out = positional_encoding_forward(x, steps, position_encoding)
    out = jax.block_until_ready(out)
    ref = x + (position_encoding + 1.0 - (1.0 / 500.0) * steps)
    assert out.shape == (B, D)
    assert jnp.allclose(out, ref, atol=1e-6), "mismatch vs reference (zero pe)"

    # Non-zero pe exercises the broadcast path.
    pe_nz = jax.random.normal(jax.random.PRNGKey(1), (D,), dtype=jnp.float32)
    out_nz = jax.block_until_ready(positional_encoding_forward(x, steps, pe_nz))
    ref_nz = x + (pe_nz + 1.0 - (1.0 / 500.0) * steps)
    assert jnp.allclose(out_nz, ref_nz, atol=1e-6), "mismatch vs reference (nonzero pe)"

    # Larger-B path: exercises the lane-dense layout + padding slice-back.
    B2 = 2051                          # not a multiple of the group -> pad + crop
    x2 = jax.random.normal(jax.random.PRNGKey(2), (B2, D), dtype=jnp.float32)
    out2 = jax.block_until_ready(positional_encoding_forward(x2, steps, pe_nz))
    ref2 = x2 + (pe_nz + 1.0 - (1.0 / 500.0) * steps)
    assert out2.shape == (B2, D)
    assert jnp.allclose(out2, ref2, atol=1e-6), "mismatch vs reference (large B, lane-dense)"

    print("KERNEL_OK")
</pallas_src>

<mosaic_0001>
module attributes {stable_mosaic.version = 11 : i64} {
  func.func @_pos_enc_kernel(%arg0: i32, %arg1: memref<1xf32, #tpu.memory_space<smem>>, %arg2: memref<1x50xf32, #tpu.memory_space<vmem>>, %arg3: memref<8x50xf32, #tpu.memory_space<vmem>>, %arg4: memref<8x50xf32, #tpu.memory_space<vmem>>) attributes {dimension_semantics = [#tpu.dimension_semantics<parallel>], iteration_bounds = array<i64: 1>, scalar_prefetch = 0 : i64, scratch_operands = 0 : i64, tpu.core_type = #tpu.core_type<tc>, window_params = [{transform_indices = @transform_0, window_bounds = array<i64: 1>}, {pipeline_mode = #tpu.pipeline_mode<synchronous>, transform_indices = @transform_1, window_bounds = array<i64: 1, 50>}, {transform_indices = @transform_2, window_bounds = array<i64: 8, 50>}, {transform_indices = @transform_3, window_bounds = array<i64: 8, 50>}]} {
    %c0 = arith.constant 0 : index
    %0 = memref.load %arg1[%c0] : memref<1xf32, #tpu.memory_space<smem>>
    %cst = arith.constant 2.000000e-03 : f32
    %1 = arith.mulf %0, %cst : f32
    %cst_0 = arith.constant 1.000000e+00 : f32
    %2 = arith.subf %cst_0, %1 : f32
    %c0_1 = arith.constant 0 : index
    %c0_2 = arith.constant 0 : index
    %3 = vector.load %arg2[%c0_1, %c0_2] : memref<1x50xf32, #tpu.memory_space<vmem>>, vector<1x50xf32>
    %4 = vector.broadcast %2 : f32 to vector<1x50xf32>
    %5 = arith.addf %3, %4 : vector<1x50xf32>
    %c0_3 = arith.constant 0 : index
    %c0_4 = arith.constant 0 : index
    %6 = vector.load %arg3[%c0_3, %c0_4] : memref<8x50xf32, #tpu.memory_space<vmem>>, vector<8x50xf32>
    %7 = vector.broadcast %5 : vector<1x50xf32> to vector<8x50xf32>
    %8 = arith.addf %6, %7 : vector<8x50xf32>
    %c0_5 = arith.constant 0 : index
    %c0_6 = arith.constant 0 : index
    %9 = vector.load %arg4[%c0_5, %c0_6] : memref<8x50xf32, #tpu.memory_space<vmem>>, vector<8x50xf32>
    tpu.vector_store %arg4[%c0_5, %c0_6], %8 {strides = array<i32>} : memref<8x50xf32, #tpu.memory_space<vmem>>, vector<8x50xf32>,
    return
  }
  func.func @transform_0(%arg0: i32) -> i32 {
    %c0_i32 = arith.constant 0 : i32
    %c0_i32_0 = arith.constant 0 : i32
    return %c0_i32 : i32
  }
  func.func @transform_1(%arg0: i32) -> (i32, i32) {
    %c0_i32 = arith.constant 0 : i32
    %c0_i32_0 = arith.constant 0 : i32
    %c0_i32_1 = arith.constant 0 : i32
    return %c0_i32, %c0_i32_0 : i32, i32
  }
  func.func @transform_2(%arg0: i32) -> (i32, i32) {
    %c0_i32 = arith.constant 0 : i32
    %c0_i32_0 = arith.constant 0 : i32
    return %arg0, %c0_i32 : i32, i32
  }
  func.func @transform_3(%arg0: i32) -> (i32, i32) {
    %c0_i32 = arith.constant 0 : i32
    %c0_i32_0 = arith.constant 0 : i32
    return %arg0, %c0_i32 : i32, i32
  }
}

</mosaic_0001>

<bundles_post_ra>
// kernel: tpu_custom_call.1
= control target key start
LH: loop header
LB: loop body
LE: loop exit
PB: predicated region body
PF: predicated region fallthrough
CT: control target
= control target key end

     0   :  { %9 = vsyncpa [#allocation4], 0  ;;  %s161_s0 = inlined_call_operand.<no memory space> [shape: f32[1], index: 0, kind: input, shape index: {}]   ;;  %s162_s1 = inlined_call_operand.vmem [shape: f32[1,50], index: 1, kind: input, shape index: {}]   ;;  %s163_s2 = inlined_call_operand.hbm [shape: f32[8,50], index: 2, kind: input, shape index: {}]   ;;  %s164_s3 = inlined_call_operand.hbm [shape: f32[8,50], index: 3, kind: output, shape index: {}]  }
   0x1   :  { %10 = vsyncpa [#allocation5], 0  ;;  %s109_s12 = smov [#allocation3]   ;;  %s61_s16 = scalar_lea.hbm %s163_s2, 128 }
   0x2   :  { %s21_s13 = sshll.u32 %s109_s12, 4  ;;  %p62_p0 = scmp.ne.s32.totalorder %s163_s2, %s61_s16  ;;  %s22_s13 = int_to_ptr.vmem [resolvable:$true] %s21_s13 }
   0x3   :  { %p65_p1 = scmp.lt.u32.totalorder %s61_s16, %s163_s2 }
   0x5   :  { %p67_p2 = pnand %p65_p1, %p62_p0 }
   0x7   :  { %70 = shalt.err (!%p67_p2)
}
   0x8   :  { %s71_s21 = scalar_lea.vmem %s22_s13, 128  ;;  %p76_p4 = scmp.lt.s32.totalorder %s22_s13, %s22_s13 }
   0x9   :  { %p72_p3 = scmp.ne.s32.totalorder %s22_s13, %s71_s21  ;;  %p77_p5 = scmp.lt.s32.totalorder %s71_s21, %s71_s21 }
   0xb   :  { %p78_p6 = por %p77_p5, %p76_p4 }
   0xd   :  { %p79_p7 = pnand %p78_p6, %p72_p3 }
   0xf   :  { %82 = shalt.err (!%p79_p7)
}
  0x10   :  { %24 = dma.hbm_to_vmem [thread:$0]  %s163_s2, 128, %s22_s13, [#allocation4]  }
  0x11   :  { %105 = dma.done.wait [#allocation4], 128  }
  0x12   :  { %106 = vsyncadd [#allocation4], 4294967168  ;;  %s29_s26 = smul.f32 0.002, %s161_s0  ;;  %v36_v0 = vlaneseq  ;;  %v31_v4 = vld [vmem:[%s162_s1] sm:$0x1] }
  0x13   :  { %v34_v6 = vld [vmem:[#allocation3] sm:$0xff]  ;;  %s110_s30 = smov [#allocation6]   ;;  %vm42_vm0 = vcmask 408576  }
  0x14   :  { %s30_s27 = ssub.f32 1.0, %s29_s26  ;;  %v37_v1 = vshrl.u32 %v36_v0, 7  ;;  %s50_s4 = sshll.u32 %s110_s30, 4  ;;  %s51_s4 = int_to_ptr.vmem [resolvable:$true] %s50_s4 }
  0x15   :  { %s83_s2 = scalar_lea.vmem %s51_s4, 128  ;;  %p88_p9 = scmp.lt.s32.totalorder %s51_s4, %s51_s4 }
  0x16   :  { %v32_v2 = vstv %s30_s27  ;;  %v38_v3 = vsub.s32 0, %v37_v1  ;;  %p84_p8 = scmp.ne.s32.totalorder %s51_s4, %s83_s2  ;;  %p89_p10 = scmp.lt.s32.totalorder %s83_s2, %s83_s2 }
  0x17   :  { %v33_v5 = vadd.f32 %v32_v2, %v31_v4 }
  0x18   :  { %p90_p11 = por %p89_p10, %p88_p9 }
  0x19   :  { %v39_v7 = vrot.slane %v33_v5, %v38_v3 }
  0x1a   :  { %p91_p12 = pnand %p90_p11, %p84_p8 }
  0x1b   :  { %v41_v8 = vadd.f32 %v39_v7, %v34_v6 }
  0x1d   :  { %43 = vst.msk [vmem:[#allocation6] sm:$0xff] %vm42_vm0, %v41_v8 }
  0x1e   :  { %94 = shalt.err (!%p91_p12)
}
  0x1f   :  { %s95_s1 = scalar_lea.hbm %s164_s3, 128 }
  0x20   :  { %p96_p13 = scmp.ne.s32.totalorder %s164_s3, %s95_s1  ;;  %p99_p0 = scmp.lt.u32.totalorder %s95_s1, %s164_s3 }
  0x22   :  { %p101_p1 = pnand %p99_p0, %p96_p13 }
  0x24   :  { %104 = shalt.err (!%p101_p1)
}
  0x25   :  { %53 = dma.vmem_to_hbm [thread:$0]  %s51_s4, 128, %s164_s3, [#allocation5]  }
  0x26   :  { %107 = dma.done.wait [#allocation5], 128  }
  0x27   :  { %108 = vsyncadd [#allocation5], 4294967168 }
  0x28   :  { %57 = vsyncpa [#allocation4], 1 }
  0x29   :  { %58 = vsyncpa [#allocation5], 1 }

</bundles_post_ra>
